<compile_context>
chip_gen: v7x
topology: tpu7x:2x2x1
jax: 0.10.0
libtpu: 0.0.40
codegen_flags: <defaults>
</compile_context>

<pallas_src>
import jax
import jax.numpy as jnp
from jax.experimental import pallas as pl
from jax.experimental.pallas import tpu as pltpu

LANE = 128  # lane width of the fused hidden / output activations


def _round_up(x: int, m: int) -> int:
    return ((x + m - 1) // m) * m


def _make_critic_kernel(output_size: int):
    """Build the fused critic kernel with the (static) output size closed over."""

    def kernel(x_ref, w0_ref, b0_ref, wr_ref, br_ref, out_ref):
        # x_ref : (TB, In_pad)        bf16   concatenated [state|action] rows
        # w0_ref: (In_pad, 128)       bf16   fused layer-0 weights (mean | std lanes)
        # b0_ref: (1, 128)            f32    fused layer-0 bias
        # wr_ref: (L-1, 128, 128)     bf16   block-diagonal fused layers 1..L-1
        # br_ref: (L-1, 1, 128)       f32    fused biases for layers 1..L-1
        # out_ref: (TB, 128)          f32    lanes [0,Dout)=mean, [Dout,2Dout)=std
        n_rest = wr_ref.shape[0]

        # Layer 0: both branches side-by-side in the lane dimension.
        h = jnp.dot(x_ref[...], w0_ref[...], preferred_element_type=jnp.float32)
        h = jnp.maximum(h + b0_ref[...], 0.0)

        # Remaining layers: block-diagonal fused weights. Last layer is linear.
        for l in range(n_rest):
            z = jnp.dot(h.astype(wr_ref.dtype), wr_ref[l],
                        preferred_element_type=jnp.float32)
            z = z + br_ref[l]
            h = jnp.maximum(z, 0.0) if l < n_rest - 1 else z

        # h now holds mean in lanes [0,Dout) and raw std in lanes [Dout, 2*Dout).
        lane_idx = jax.lax.broadcasted_iota(jnp.int32, h.shape, 1)
        is_std = (lane_idx >= output_size) & (lane_idx < 2 * output_size)
        # Numerically stable softplus (+1e-6), applied only to the std lanes.
        # (log1p form is marginally more accurate for large |x| but log(1+e)
        #  is kept for guaranteed Mosaic lowering; difference << the +1e-6 offset.)
        sp = jnp.maximum(h, 0.0) + jnp.log(1.0 + jnp.exp(-jnp.abs(h))) + 1e-6
        out_ref[...] = jnp.where(is_std, sp, h).astype(out_ref.dtype)

    return kernel


def pack_fused_critic_params(mean_params, std_params, input_size: int,
                             w_dtype=jnp.bfloat16, b_dtype=jnp.float32,
                             lane: int = LANE):
    """Fuse the two branch MLPs into one block-diagonal weight/bias stack.

    Layer 0 weight is (In_pad, lane): mean W0 in lanes [0,H1), std W0 in [H1,2H1).
    Layers 1..L-1 are (lane, lane) block-diagonal: mean block at [0:fi, 0:fo],
    std block at [fi:2fi, fo:2fo]. All padding entries are exactly zero, so the
    padded lanes carry zeros through every layer.
    """
    n_layers = len(mean_params)
    assert len(std_params) == n_layers

    in_pad = _round_up(max(input_size, 8), 8)

    w0m, b0m = mean_params[0]
    w0s, b0s = std_params[0]
    h1 = w0m.shape[1]
    assert 2 * h1 <= lane, "fused hidden width must fit in one lane group"
    w0 = jnp.zeros((in_pad, lane), w_dtype)
    w0 = w0.at[:input_size, :h1].set(w0m.astype(w_dtype))
    w0 = w0.at[:input_size, h1:2 * h1].set(w0s.astype(w_dtype))
    b0 = jnp.zeros((1, lane), b_dtype)
    b0 = b0.at[0, :h1].set(b0m.astype(b_dtype))
    b0 = b0.at[0, h1:2 * h1].set(b0s.astype(b_dtype))

    wr = jnp.zeros((n_layers - 1, lane, lane), w_dtype)
    br = jnp.zeros((n_layers - 1, 1, lane), b_dtype)
    for l in range(1, n_layers):
        wm, bm = mean_params[l]
        ws, bs = std_params[l]
        fi, fo = wm.shape
        assert 2 * fi <= lane and 2 * fo <= lane
        wr = wr.at[l - 1, :fi, :fo].set(wm.astype(w_dtype))
        wr = wr.at[l - 1, fi:2 * fi, fo:2 * fo].set(ws.astype(w_dtype))
        br = br.at[l - 1, 0, :fo].set(bm.astype(b_dtype))
        br = br.at[l - 1, 0, fo:2 * fo].set(bs.astype(b_dtype))

    return w0, b0, wr, br


def continuous_distributed_critic_forward(state, action, packed_params,
                                           output_size: int, *,
                                           max_tile_b: int = 1024,
                                           min_grid: int = 1):
    """state: (B, Ds), action: (B, Da) -> (mean (B,Dout), std (B,Dout)).

    `min_grid=2` is useful on v7x (2 TensorCores) for large training batches; the
    default of 1 keeps per-grid-step overhead minimal on v5e/v6e.
    """
    w0, b0, wr, br = packed_params
    in_pad, lane = w0.shape

    x = jnp.concatenate([state, action], axis=1)
    B, In = x.shape
    assert In <= in_pad, "input feature dim must fit in the packed layer-0 rows"

    # Batch tiling: ceil-split the 8-padded batch so padding never ~doubles it.
    b_pad8 = _round_up(B, 8)
    n_tiles = max(pl.cdiv(b_pad8, max_tile_b), min_grid)
    n_tiles = min(n_tiles, max(b_pad8 // 8, 1))      # no empty tiles
    tb = _round_up(pl.cdiv(b_pad8, n_tiles), 8)
    n_tiles = pl.cdiv(b_pad8, tb)
    b_pad = n_tiles * tb

    # Natural feature width (rounded to 8 sublanes), explicitly zero-filled so the
    # extra rows/lanes are real zeros (no garbage * 0 NaN risk). bf16 for the MXU.
    x_p = jnp.zeros((b_pad, in_pad), jnp.bfloat16).at[:B, :In].set(
        x.astype(jnp.bfloat16))

    out = pl.pallas_call(
        _make_critic_kernel(output_size),
        out_shape=jax.ShapeDtypeStruct((b_pad, lane), jnp.float32),
        grid=(n_tiles,),
        in_specs=[
            pl.BlockSpec((tb, in_pad), lambda i: (i, 0)),
            pl.BlockSpec((in_pad, lane), lambda i: (0, 0)),
            pl.BlockSpec((1, lane), lambda i: (0, 0)),
            pl.BlockSpec(wr.shape, lambda i: (0, 0, 0)),
            pl.BlockSpec(br.shape, lambda i: (0, 0, 0)),
        ],
        out_specs=pl.BlockSpec((tb, lane), lambda i: (i, 0)),
        compiler_params=pltpu.CompilerParams(
            dimension_semantics=("parallel",)),   # lets v7x shard batch tiles across TCs
    )(x_p, w0, b0, wr, br)

    mean = out[:B, :output_size]
    std = out[:B, output_size:2 * output_size]
    return mean, std


def init_mlp_params(key, input_size, hidden_sizes, output_size, dtype=jnp.float32):
    """PyTorch-Linear-style init, stored transposed as (in_features, out_features)."""
    params = []
    sizes = [input_size] + list(hidden_sizes) + [output_size]
    for i in range(len(sizes) - 1):
        fan_in, fan_out = sizes[i], sizes[i + 1]
        key, kw, kb = jax.random.split(key, 3)
        bound = 1.0 / (fan_in ** 0.5)
        w = jax.random.uniform(kw, (fan_in, fan_out), dtype, -bound, bound)
        b = jax.random.uniform(kb, (fan_out,), dtype, -bound, bound)
        params.append((w, b))
    return params


if __name__ == "__main__":
    key = jax.random.PRNGKey(0)
    batch = 8
    state_dim = 12
    action_dim = 4
    hidden_sizes = [32, 32]
    output_size = 1

    ks, ka, km, kd = jax.random.split(key, 4)
    state = jax.random.normal(ks, (batch, state_dim), jnp.float32)
    action = jax.random.normal(ka, (batch, action_dim), jnp.float32)

    input_size = state_dim + action_dim
    mean_params = init_mlp_params(km, input_size, hidden_sizes, output_size)
    std_params = init_mlp_params(kd, input_size, hidden_sizes, output_size)
    packed = pack_fused_critic_params(mean_params, std_params, input_size)

    mean, std = continuous_distributed_critic_forward(
        state, action, packed, output_size)
    mean = jax.block_until_ready(mean)
    std = jax.block_until_ready(std)

    # Pure-JAX f32 reference mirroring the PyTorch module.
    def mlp_ref(params, x):
        h = x
        for i, (w, b) in enumerate(params):
            h = h @ w + b
            if i < len(params) - 1:
                h = jnp.maximum(h, 0.0)
        return h

    xa = jnp.concatenate([state, action], axis=1)
    mean_ref = mlp_ref(mean_params, xa)
    std_ref = jax.nn.softplus(mlp_ref(std_params, xa)) + 1e-6

    assert mean.shape == (batch, output_size)
    assert std.shape == (batch, output_size)
    # bf16 matmul operands (f32 accumulation) -> relaxed tolerance vs. f32 reference.
    assert jnp.allclose(mean, mean_ref, atol=2e-2, rtol=2e-2)
    assert jnp.allclose(std, std_ref, atol=2e-2, rtol=2e-2)

    print("KERNEL_OK")
</pallas_src>

<mosaic_0001>
module attributes {stable_mosaic.version = 11 : i64} {
  func.func @kernel(%arg0: i32, %arg1: memref<8x16xbf16, #tpu.memory_space<vmem>>, %arg2: memref<16x128xbf16, #tpu.memory_space<vmem>>, %arg3: memref<1x128xf32, #tpu.memory_space<vmem>>, %arg4: memref<2x128x128xbf16, #tpu.memory_space<vmem>>, %arg5: memref<2x1x128xf32, #tpu.memory_space<vmem>>, %arg6: memref<8x128xf32, #tpu.memory_space<vmem>>) attributes {dimension_semantics = [#tpu.dimension_semantics<parallel>], iteration_bounds = array<i64: 1>, scalar_prefetch = 0 : i64, scratch_operands = 0 : i64, tpu.core_type = #tpu.core_type<tc>, window_params = [{transform_indices = @transform_0, window_bounds = array<i64: 8, 16>}, {pipeline_mode = #tpu.pipeline_mode<synchronous>, transform_indices = @transform_1, window_bounds = array<i64: 16, 128>}, {pipeline_mode = #tpu.pipeline_mode<synchronous>, transform_indices = @transform_2, window_bounds = array<i64: 1, 128>}, {pipeline_mode = #tpu.pipeline_mode<synchronous>, transform_indices = @transform_3, window_bounds = array<i64: 2, 128, 128>}, {pipeline_mode = #tpu.pipeline_mode<synchronous>, transform_indices = @transform_4, window_bounds = array<i64: 2, 1, 128>}, {transform_indices = @transform_5, window_bounds = array<i64: 8, 128>}]} {
    %c0 = arith.constant 0 : index
    %c0_0 = arith.constant 0 : index
    %0 = vector.load %arg1[%c0, %c0_0] : memref<8x16xbf16, #tpu.memory_space<vmem>>, vector<8x16xbf16>
    %c0_1 = arith.constant 0 : index
    %c0_2 = arith.constant 0 : index
    %1 = vector.load %arg2[%c0_1, %c0_2] : memref<16x128xbf16, #tpu.memory_space<vmem>>, vector<16x128xbf16>
    %cst = arith.constant dense<0.000000e+00> : vector<8x128xf32>
    %2 = tpu.matmul %0, %1, %cst {dimension_numbers = #tpu.dot_dimension_numbers<[1], [0], [0], [1], [0, 0, 1, 1], [], []>} : vector<8x16xbf16>, vector<16x128xbf16>, vector<8x128xf32> -> vector<8x128xf32>
    %c0_3 = arith.constant 0 : index
    %c0_4 = arith.constant 0 : index
    %3 = vector.load %arg3[%c0_3, %c0_4] : memref<1x128xf32, #tpu.memory_space<vmem>>, vector<1x128xf32>
    %4 = vector.broadcast %3 : vector<1x128xf32> to vector<8x128xf32>
    %5 = arith.addf %2, %4 : vector<8x128xf32>
    %cst_5 = arith.constant 0.000000e+00 : f32
    %6 = vector.broadcast %cst_5 : f32 to vector<8x128xf32>
    %7 = arith.maximumf %5, %6 : vector<8x128xf32>
    %8 = arith.truncf %7 : vector<8x128xf32> to vector<8x128xbf16>
    %c0_6 = arith.constant 0 : index
    %c0_7 = arith.constant 0 : index
    %c0_8 = arith.constant 0 : index
    %9 = vector.load %arg4[%c0_6, %c0_7, %c0_8] : memref<2x128x128xbf16, #tpu.memory_space<vmem>>, vector<1x128x128xbf16>
    %10 = vector.shape_cast %9 : vector<1x128x128xbf16> to vector<128x128xbf16>
    %cst_9 = arith.constant dense<0.000000e+00> : vector<8x128xf32>
    %11 = tpu.matmul %8, %10, %cst_9 {dimension_numbers = #tpu.dot_dimension_numbers<[1], [0], [0], [1], [0, 0, 1, 1], [], []>} : vector<8x128xbf16>, vector<128x128xbf16>, vector<8x128xf32> -> vector<8x128xf32>
    %c0_10 = arith.constant 0 : index
    %c0_11 = arith.constant 0 : index
    %c0_12 = arith.constant 0 : index
    %12 = vector.load %arg5[%c0_10, %c0_11, %c0_12] : memref<2x1x128xf32, #tpu.memory_space<vmem>>, vector<1x1x128xf32>
    %13 = vector.shape_cast %12 : vector<1x1x128xf32> to vector<1x128xf32>
    %14 = vector.broadcast %13 : vector<1x128xf32> to vector<8x128xf32>
    %15 = arith.addf %11, %14 : vector<8x128xf32>
    %cst_13 = arith.constant 0.000000e+00 : f32
    %16 = vector.broadcast %cst_13 : f32 to vector<8x128xf32>
    %17 = arith.maximumf %15, %16 : vector<8x128xf32>
    %18 = arith.truncf %17 : vector<8x128xf32> to vector<8x128xbf16>
    %c1 = arith.constant 1 : index
    %c0_14 = arith.constant 0 : index
    %c0_15 = arith.constant 0 : index
    %19 = vector.load %arg4[%c1, %c0_14, %c0_15] : memref<2x128x128xbf16, #tpu.memory_space<vmem>>, vector<1x128x128xbf16>
    %20 = vector.shape_cast %19 : vector<1x128x128xbf16> to vector<128x128xbf16>
    %cst_16 = arith.constant dense<0.000000e+00> : vector<8x128xf32>
    %21 = tpu.matmul %18, %20, %cst_16 {dimension_numbers = #tpu.dot_dimension_numbers<[1], [0], [0], [1], [0, 0, 1, 1], [], []>} : vector<8x128xbf16>, vector<128x128xbf16>, vector<8x128xf32> -> vector<8x128xf32>
    %c1_17 = arith.constant 1 : index
    %c0_18 = arith.constant 0 : index
    %c0_19 = arith.constant 0 : index
    %22 = vector.load %arg5[%c1_17, %c0_18, %c0_19] : memref<2x1x128xf32, #tpu.memory_space<vmem>>, vector<1x1x128xf32>
    %23 = vector.shape_cast %22 : vector<1x1x128xf32> to vector<1x128xf32>
    %24 = vector.broadcast %23 : vector<1x128xf32> to vector<8x128xf32>
    %25 = arith.addf %21, %24 : vector<8x128xf32>
    %26 = tpu.iota {dimensions = array<i32: 1>} : vector<8x128xi32>
    %c1_i32 = arith.constant 1 : i32
    %27 = vector.broadcast %c1_i32 : i32 to vector<8x128xi32>
    %28 = arith.cmpi sge, %26, %27 : vector<8x128xi32>
    %c2_i32 = arith.constant 2 : i32
    %29 = vector.broadcast %c2_i32 : i32 to vector<8x128xi32>
    %30 = arith.cmpi slt, %26, %29 : vector<8x128xi32>
    %31 = arith.andi %28, %30 : vector<8x128xi1>
    %cst_20 = arith.constant 0.000000e+00 : f32
    %32 = vector.broadcast %cst_20 : f32 to vector<8x128xf32>
    %33 = arith.maximumf %25, %32 : vector<8x128xf32>
    %34 = math.absf %25 : vector<8x128xf32>
    %cst_21 = arith.constant 0.000000e+00 : f32
    %35 = vector.broadcast %cst_21 : f32 to vector<8x128xf32>
    %36 = arith.subf %35, %34 : vector<8x128xf32>
    %37 = math.exp %36 : vector<8x128xf32>
    %cst_22 = arith.constant 1.000000e+00 : f32
    %38 = vector.broadcast %cst_22 : f32 to vector<8x128xf32>
    %39 = arith.addf %38, %37 : vector<8x128xf32>
    %40 = math.log %39 : vector<8x128xf32>
    %41 = arith.addf %33, %40 : vector<8x128xf32>
    %cst_23 = arith.constant 9.99999997E-7 : f32
    %42 = vector.broadcast %cst_23 : f32 to vector<8x128xf32>
    %43 = arith.addf %41, %42 : vector<8x128xf32>
    %44 = arith.select %31, %43, %25 : vector<8x128xi1>, vector<8x128xf32>
    %c0_24 = arith.constant 0 : index
    %c0_25 = arith.constant 0 : index
    %45 = vector.load %arg6[%c0_24, %c0_25] : memref<8x128xf32, #tpu.memory_space<vmem>>, vector<8x128xf32>
    tpu.vector_store %arg6[%c0_24, %c0_25], %44 {strides = array<i32>} : memref<8x128xf32, #tpu.memory_space<vmem>>, vector<8x128xf32>,
    return
  }
  func.func @transform_0(%arg0: i32) -> (i32, i32) {
    %c0_i32 = arith.constant 0 : i32
    %c0_i32_0 = arith.constant 0 : i32
    return %arg0, %c0_i32 : i32, i32
  }
  func.func @transform_1(%arg0: i32) -> (i32, i32) {
    %c0_i32 = arith.constant 0 : i32
    %c0_i32_0 = arith.constant 0 : i32
    %c0_i32_1 = arith.constant 0 : i32
    return %c0_i32, %c0_i32_0 : i32, i32
  }
  func.func @transform_2(%arg0: i32) -> (i32, i32) {
    %c0_i32 = arith.constant 0 : i32
    %c0_i32_0 = arith.constant 0 : i32
    %c0_i32_1 = arith.constant 0 : i32
    return %c0_i32, %c0_i32_0 : i32, i32
  }
  func.func @transform_3(%arg0: i32) -> (i32, i32, i32) {
    %c0_i32 = arith.constant 0 : i32
    %c0_i32_0 = arith.constant 0 : i32
    %c0_i32_1 = arith.constant 0 : i32
    %c0_i32_2 = arith.constant 0 : i32
    return %c0_i32, %c0_i32_0, %c0_i32_1 : i32, i32, i32
  }
  func.func @transform_4(%arg0: i32) -> (i32, i32, i32) {
    %c0_i32 = arith.constant 0 : i32
    %c0_i32_0 = arith.constant 0 : i32
    %c0_i32_1 = arith.constant 0 : i32
    %c0_i32_2 = arith.constant 0 : i32
    return %c0_i32, %c0_i32_0, %c0_i32_1 : i32, i32, i32
  }
  func.func @transform_5(%arg0: i32) -> (i32, i32) {
    %c0_i32 = arith.constant 0 : i32
    %c0_i32_0 = arith.constant 0 : i32
    return %arg0, %c0_i32 : i32, i32
  }
}

</mosaic_0001>

<bundles_post_ra>
// kernel: tpu_custom_call.1
= control target key start
LH: loop header
LB: loop body
LE: loop exit
PB: predicated region body
PF: predicated region fallthrough
CT: control target
= control target key end

     0   :  { %10 = vsyncpa [#allocation3], 0  ;;  %s714_s0 = inlined_call_operand.hbm [shape: bf16[8,16], index: 0, kind: input, shape index: {}]   ;;  %s715_s1 = inlined_call_operand.hbm [shape: bf16[16,128], index: 1, kind: input, shape index: {}]   ;;  %s716_s2 = inlined_call_operand.vmem [shape: f32[1,128], index: 2, kind: input, shape index: {}]   ;;  %s717_s3 = inlined_call_operand.hbm [shape: bf16[2,128,128], index: 3, kind: input, shape index: {}]   ;;  %s718_s4 = inlined_call_operand.vmem [shape: f32[2,1,128], index: 4, kind: input, shape index: {}]   ;;  %s719_s5 = inlined_call_operand.hbm [shape: f32[8,128], index: 5, kind: output, shape index: {}]  }
   0x1   :  { %11 = vsyncpa [#allocation6], 0 }
   0x2   :  { %12 = vsyncpa [#allocation4], 0  ;;  %s593_s18 = smov [#allocation5]   ;;  %s499_s22 = scalar_lea.hbm %s715_s1, 128 }
   0x3   :  { %s28_s19 = sshll.u32 %s593_s18, 4  ;;  %p500_p0 = scmp.ne.s32.totalorder %s715_s1, %s499_s22  ;;  %s29_s19 = int_to_ptr.vmem [resolvable:$true] %s28_s19 }
   0x4   :  { %p503_p1 = scmp.lt.u32.totalorder %s499_s22, %s715_s1 }
   0x6   :  { %p505_p2 = pnand %p503_p1, %p500_p0 }
   0x8   :  { %508 = shalt.err (!%p505_p2)
}
   0x9   :  { %s509_s27 = scalar_lea.vmem %s29_s19, 128  ;;  %p514_p4 = scmp.lt.s32.totalorder %s29_s19, %s29_s19 }
   0xa   :  { %p510_p3 = scmp.ne.s32.totalorder %s29_s19, %s509_s27  ;;  %p515_p5 = scmp.lt.s32.totalorder %s509_s27, %s509_s27 }
   0xc   :  { %p516_p6 = por %p515_p5, %p514_p4 }
   0xe   :  { %p517_p7 = pnand %p516_p6, %p510_p3 }
  0x10   :  { %520 = shalt.err (!%p517_p7)
}
  0x11   :  { %s594_s28 = smov 64   ;;  %s595_s29 = smov 4  }
  0x12   :  { %34 = dma.hbm_to_vmem [thread:$0]  %s715_s1, 128, %s29_s19, [#allocation6], %s594_s28, %s594_s28, %s595_s29  }
  0x13   :  { %s596_s7 = smov [#allocation2]   ;;  %s597_s9 = smov [#allocation7]  }
  0x14   :  { %s19_s8 = sshll.u32 %s596_s7, 4  ;;  %s42_s10 = sshll.u32 %s597_s9, 4  ;;  %s20_s8 = int_to_ptr.vmem [resolvable:$true] %s19_s8  ;;  %s43_s10 = int_to_ptr.vmem [resolvable:$true] %s42_s10 }
  0x15   :  { %s521_s13 = scalar_lea.hbm %s714_s0, 64 }
  0x16   :  { %p522_p8 = scmp.ne.s32.totalorder %s714_s0, %s521_s13  ;;  %p525_p9 = scmp.lt.u32.totalorder %s521_s13, %s714_s0 }
  0x18   :  { %p527_p10 = pnand %p525_p9, %p522_p8 }
  0x1a   :  { %530 = shalt.err (!%p527_p10)
}
  0x1b   :  { %s531_s1 = scalar_lea.vmem %s20_s8, 64  ;;  %p536_p12 = scmp.lt.s32.totalorder %s20_s8, %s20_s8 }
  0x1c   :  { %p532_p11 = scmp.ne.s32.totalorder %s20_s8, %s531_s1  ;;  %p537_p13 = scmp.lt.s32.totalorder %s531_s1, %s531_s1 }
  0x1e   :  { %p538_p0 = por %p537_p13, %p536_p12 }
  0x20   :  { %p539_p1 = pnand %p538_p0, %p532_p11 }
  0x22   :  { %542 = shalt.err (!%p539_p1)
}
  0x23   :  { %22 = dma.hbm_to_vmem [thread:$0]  %s714_s0, 64, %s20_s8, [#allocation3]  }
  0x24   :  { %s543_s22 = scalar_lea.hbm %s717_s3, 2048 }
  0x25   :  { %p544_p2 = scmp.ne.s32.totalorder %s717_s3, %s543_s22  ;;  %p547_p3 = scmp.lt.u32.totalorder %s543_s22, %s717_s3 }
  0x27   :  { %p549_p4 = pnand %p547_p3, %p544_p2 }
  0x29   :  { %552 = shalt.err (!%p549_p4)
}
  0x2a   :  { %s553_s27 = scalar_lea.vmem %s43_s10, 2048  ;;  %p558_p6 = scmp.lt.s32.totalorder %s43_s10, %s43_s10 }
  0x2b   :  { %p554_p5 = scmp.ne.s32.totalorder %s43_s10, %s553_s27  ;;  %p559_p7 = scmp.lt.s32.totalorder %s553_s27, %s553_s27 }
  0x2d   :  { %p560_p8 = por %p559_p7, %p558_p6 }
  0x2f   :  { %p561_p9 = pnand %p560_p8, %p554_p5 }
  0x31   :  { %564 = shalt.err (!%p561_p9)
}
  0x32   :  { %48 = dma.hbm_to_vmem [thread:$0]  %s717_s3, 2048, %s43_s10, [#allocation6], %s594_s28, %s594_s28, %s595_s29  }
  0x33   :  { %587 = dma.done.wait [#allocation3], 64  }
  0x34   :  { %588 = vsyncadd [#allocation3], 4294967232 }
  0x35   :  { %589 = dma.done.wait [#allocation6], 2176  }
  0x36   :  { %590 = vsyncadd [#allocation6], 4294965120  ;;  %v598_v0 = vmov 0.0   ;;  %vm599_vm0 = vmmov 0   ;;  %v478_v1 = vld [vmem:[#allocation5] sm:$0xff]   ;;  %vm77_vm1 = vcmask 130048   ;;  %v349_v46 = vlaneseq }
  0x37   :  { %424 = vmatprep.subr.bf16.mxu0 %v598_v0  ;;  %426 = vmatprep.mubr.msk.bf16.mxu0 %vm599_vm0, %v598_v0  ;;  %v61_v2 = vld [vmem:[#allocation2] sm:$0xf]  ;;  %v479_v3 = vld [vmem:[#allocation7] sm:$0xff]   ;;  %v480_v4 = vld [vmem:[#allocation7 + $0x8] sm:$0xff]  }
  0x38   :  { %430 = vmatprep.subr.bf16.mxu1 %v598_v0  ;;  %446 = vmatprep.mubr.msk.bf16.mxu1 %vm599_vm0, %v598_v0  ;;  %v481_v5 = vld [vmem:[#allocation7 + $0x10] sm:$0xff]   ;;  %v482_v6 = vld [vmem:[#allocation7 + $0x18] sm:$0xff]   ;;  %v483_v7 = vld [vmem:[#allocation7 + $0x20] sm:$0xff]   ;;  %v350_v47 = vand.u32 127, %v349_v46 }
  0x39   :  { %425 = vmatpush3.bf16.msra.mxu0 %v478_v1  ;;  %431 = vmatpush3.bf16.msra.mxu1 %v479_v3  ;;  %v484_v8 = vld [vmem:[#allocation7 + $0x28] sm:$0xff]   ;;  %v485_v9 = vld [vmem:[#allocation7 + $0x30] sm:$0xff]   ;;  %v486_v10 = vld [vmem:[#allocation7 + $0x38] sm:$0xff]  }
  0x3a   :  { %450 = vmatprep.subr.bf16.mxu0 %v598_v0  ;;  %432 = vmatprep.subr.bf16.mxu1 %v598_v0  ;;  %v487_v11 = vld [vmem:[#allocation7 + $0x40] sm:$0xff]   ;;  %v488_v12 = vld [vmem:[#allocation7 + $0x48] sm:$0xff]   ;;  %v489_v13 = vld [vmem:[#allocation7 + $0x50] sm:$0xff]   ;;  %vm351_vm2 = vcmp.ge.s32.totalorder %v350_v47, 1  ;;  %vm352_vm3 = vcmp.lt.s32.totalorder %v350_v47, 2 }
  0x3b   :  { %v490_v14 = vld [vmem:[#allocation7 + $0x58] sm:$0xff]   ;;  %v491_v15 = vld [vmem:[#allocation7 + $0x60] sm:$0xff]   ;;  %v492_v16 = vld [vmem:[#allocation7 + $0x68] sm:$0xff]  }
  0x3c   :  { %427 = vmatmul.mubr.msk.bf16.vlgmr.msra.gmra.mrb[0].mxu0 %vm77_vm1, %v61_v2  ;;  %v382_v17 = vld [vmem:[%s716_s2] ss:$0 sm:$0xff]  ;;  %v494_v26 = vld [vmem:[#allocation7 + $0x78] sm:$0xff]   ;;  %v395_v35 = vld [vmem:[%s718_s4 + $0x1] ss:$0 sm:$0xff] }
  0x3d   :  { %466 = vmatprep.mubr.msk.bf16.mxu0 %vm599_vm0, %v598_v0  ;;  %433 = vmatpush3.bf16.msra.mxu1 %v480_v4  ;;  %v493_v25 = vld [vmem:[#allocation7 + $0x70] sm:$0xff]   ;;  %vm353_vm4 = vmand %vm351_vm2, %vm352_vm3 }
  0x3e   :  { %434 = vmatprep.subr.bf16.mxu1 %v598_v0  ;;  %451 = vmatpush3.bf16.msra.mxu0 %v487_v11  ;;  %v385_v27 = vld [vmem:[%s718_s4] ss:$0 sm:$0xff]  ;;  %s600_s4 = smov [#allocation8]  }
  0x3f   :  { %452 = vmatprep.subr.bf16.mxu0 %v598_v0  ;;  %s372_s8 = sshll.u32 %s600_s4, 4  ;;  %s373_s8 = int_to_ptr.vmem [resolvable:$true] %s372_s8 }
  0x40   :  { %s565_s9 = scalar_lea.vmem %s373_s8, 128  ;;  %p570_p11 = scmp.lt.s32.totalorder %s373_s8, %s373_s8 }
  0x41   :  { %435 = vmatpush3.bf16.msra.mxu1 %v481_v5  ;;  %p566_p10 = scmp.ne.s32.totalorder %s373_s8, %s565_s9  ;;  %p571_p12 = scmp.lt.s32.totalorder %s565_s9, %s565_s9 }
  0x42   :  { %436 = vmatprep.subr.bf16.mxu1 %v598_v0  ;;  %453 = vmatpush3.bf16.msra.mxu0 %v488_v12 }
  0x43   :  { %454 = vmatprep.subr.bf16.mxu0 %v598_v0  ;;  %p572_p13 = por %p571_p12, %p570_p11 }
  0x45   :  { %437 = vmatpush3.bf16.msra.mxu1 %v482_v6  ;;  %p573_p0 = pnand %p572_p13, %p566_p10 }
  0x46   :  { %438 = vmatprep.subr.bf16.mxu1 %v598_v0  ;;  %455 = vmatpush3.bf16.msra.mxu0 %v489_v13 }
  0x47   :  { %456 = vmatprep.subr.bf16.mxu0 %v598_v0 }
  0x49   :  { %439 = vmatpush3.bf16.msra.mxu1 %v483_v7 }
  0x4a   :  { %440 = vmatprep.subr.bf16.mxu1 %v598_v0  ;;  %457 = vmatpush3.bf16.msra.mxu0 %v490_v14 }
  0x4b   :  { %458 = vmatprep.subr.bf16.mxu0 %v598_v0 }
  0x4d   :  { %441 = vmatpush3.bf16.msra.mxu1 %v484_v8 }
  0x4e   :  { %442 = vmatprep.subr.bf16.mxu1 %v598_v0  ;;  %459 = vmatpush3.bf16.msra.mxu0 %v491_v15 }
  0x4f   :  { %460 = vmatprep.subr.bf16.mxu0 %v598_v0 }
  0x51   :  { %443 = vmatpush3.bf16.msra.mxu1 %v485_v9 }
  0x52   :  { %444 = vmatprep.subr.bf16.mxu1 %v598_v0  ;;  %461 = vmatpush3.bf16.msra.mxu0 %v492_v16 }
  0x53   :  { %462 = vmatprep.subr.bf16.mxu0 %v598_v0 }
  0x55   :  { %445 = vmatpush3.bf16.msra.mxu1 %v486_v10 }
  0x56   :  { %463 = vmatpush3.bf16.msra.mxu0 %v493_v25 }
  0x57   :  { %464 = vmatprep.subr.bf16.mxu0 %v598_v0 }
  0x5a   :  { %465 = vmatpush3.bf16.msra.mxu0 %v494_v26 }
 0x10f   :  { %v115_v18 = vpop.f32.mrb[0].mxu0 }
 0x110   :  { %v116_v19 = vadd.f32 %v382_v17, %v115_v18  ;;  %v428_v20 = vpop.f32.mrb[1].mxu0 }
 0x111   :  { %v118_v21 = vpop.f32.mrb[2].mxu0 }
 0x112   :  { %v121_v22 = vmax.f32 %v116_v19, 0.0  ;;  %v429_v23 = vpop.f32.mrb[3].mxu0 }
 0x114   :  { %v122_v24 = vpack.c.bf16 %v121_v22, %v121_v22 }
 0x116   :  { %447 = vmatmul.mubr.bf16.vlgmr.msra.gmra.mrb[0].mxu1 %v122_v24 }
 0x1e9   :  { %v228_v28 = vpop.f32.mrb[0].mxu1 }
 0x1ea   :  { %v229_v29 = vadd.f32 %v385_v27, %v228_v28  ;;  %v448_v30 = vpop.f32.mrb[1].mxu1 }
 0x1eb   :  { %v231_v31 = vpop.f32.mrb[2].mxu1 }
 0x1ec   :  { %v234_v32 = vmax.f32 %v229_v29, 0.0  ;;  %v449_v33 = vpop.f32.mrb[3].mxu1 }
 0x1ee   :  { %v235_v34 = vpack.c.bf16 %v234_v32, %v234_v32 }
 0x1f0   :  { %467 = vmatmul.mubr.bf16.vlgmr.msra.gmra.mrb[4].mxu0 %v235_v34 }
 0x2c3   :  { %v343_v36 = vpop.f32.mrb[4].mxu0 }
 0x2c4   :  { %v344_v37 = vadd.f32 %v395_v35, %v343_v36  ;;  %v468_v38 = vpop.f32.mrb[5].mxu0 }
 0x2c5   :  { %v346_v39 = vpop.f32.mrb[6].mxu0 }
 0x2c6   :  { %v355_v40 = vand.u32 2147483647, %v344_v37  ;;  %v469_v41 = vpop.f32.mrb[7].mxu0  ;;  %v354_v49 = vmax.f32 %v344_v37, 0.0 }
 0x2c8   :  { %v356_v42 = vsub.f32 0.0, %v355_v40 }
 0x2ca   :  { %v357_v43 = vmul.f32 1.442695, %v356_v42 }
 0x2cc   :  { %495 = vpow2.f32 %v357_v43 }
 0x2d6   :  { %v496_v44 = vpop.eup %495 }
 0x2d7   :  { %v359_v45 = vadd.f32 1.0, %v496_v44 }
 0x2d9   :  { %497 = vlog2.f32 %v359_v45 }
 0x2e3   :  { %v498_v48 = vpop.eup %497 }
 0x2e4   :  { %v361_v50 = vmul.f32 0.6931472, %v498_v48 }
 0x2e6   :  { %v362_v51 = vadd.f32 %v361_v50, %v354_v49 }
 0x2e8   :  { %v363_v52 = vadd.f32 1e-06, %v362_v51 }
 0x2ea   :  { %v364_v53 = vsel %vm353_vm4, %v363_v52, %v344_v37 }
 0x2eb   :  { %365 = vst [vmem:[#allocation8] sm:$0xff] %v364_v53 }
 0x2ec   :  { %576 = shalt.err (!%p573_p0)
}
 0x2ed   :  { %s577_s12 = scalar_lea.hbm %s719_s5, 128 }
 0x2ee   :  { %p578_p1 = scmp.ne.s32.totalorder %s719_s5, %s577_s12  ;;  %p581_p2 = scmp.lt.u32.totalorder %s577_s12, %s719_s5 }
 0x2f0   :  { %p583_p3 = pnand %p581_p2, %p578_p1 }
 0x2f2   :  { %586 = shalt.err (!%p583_p3)
}
 0x2f3   :  { %375 = dma.vmem_to_hbm [thread:$0]  %s373_s8, 128, %s719_s5, [#allocation4]  }
 0x2f4   :  { %591 = dma.done.wait [#allocation4], 128  }
 0x2f5   :  { %592 = vsyncadd [#allocation4], 4294967168 }
 0x2f6   :  { %379 = vsyncpa [#allocation3], 1 }
 0x2f7   :  { %380 = vsyncpa [#allocation6], 1 }
 0x2f8   :  { %381 = vsyncpa [#allocation4], 1 }

</bundles_post_ra>
